<compile_context>
chip_gen: v7x
topology: tpu7x:2x2x1
jax: 0.10.0
libtpu: 0.0.40
codegen_flags: <defaults>
</compile_context>

<pallas_src>
import functools

import jax
import jax.numpy as jnp
from jax.experimental import pallas as pl
from jax.experimental.pallas import tpu as pltpu


def _softmax_t_kernel(x_ref, o_ref, *, inv_temperature, channels):
    # x_ref / o_ref: (1, C, TILE_HW) block in VMEM.  Softmax runs over the
    # channel (sublane) axis; every lane (H*W position) is independent.
    #
    # NOTE: the last grid step may map a partial block (hw % TILE_HW != 0).
    # The out-of-bounds lanes then hold undefined data (possibly NaN/Inf).
    # This is safe ONLY because every op below is lane-local (sublane
    # reductions + elementwise) and Pallas masks the OOB portion of the store.
    # Do not add cross-lane (axis=-1) reductions here without restoring
    # explicit padding of the input.
    x = x_ref[0].astype(jnp.float32) * inv_temperature            # (C, TILE_HW)

    if channels <= 8:
        # C fits a single f32 sublane tile: an unrolled VPU max/add over
        # sublanes co-issues with loads/stores and avoids the XLU entirely.
        m = x[0:1]
        for c in range(1, channels):
            m = jnp.maximum(m, x[c:c + 1])
        e = jnp.exp(x - m)                                         # EUP
        s = e[0:1]
        for c in range(1, channels):
            s = s + e[c:c + 1]
    else:
        # Larger C: the compiler's sublane reduce (~ceil(C/8) full-vreg ops +
        # log-step rotates) beats a 2*(C-1)-op sublane-slice unroll and keeps
        # the XLU slot budget safe.
        m = jnp.max(x, axis=0, keepdims=True)
        e = jnp.exp(x - m)
        s = jnp.sum(e, axis=0, keepdims=True)

    # Exact reciprocal: the kernel is HBM-bound, so exact normalization is
    # free at the roofline and keeps each row summing to 1.0 for downstream
    # sampling / KL use.
    o_ref[0] = (e * pl.reciprocal(s, approx=False)).astype(o_ref.dtype)


def _default_target_block_bytes():
    """Per-generation input-block byte target.

    v7x: ~3.2 TB/s HBM shrinks per-block DMA time while the ~0.35us fixed
    per-grid-step overhead does not, so larger blocks recover several percent;
    its 64 MiB/TC physical VMEM still leaves ample room for ~5 MiB blocks.
    v5e/v6e: 2 MiB blocks already sit on the measured 85-86% roofline plateau
    and v5e's scoped-VMEM default is tighter, so do not scale up.
    """
    try:
        info = pltpu.get_tpu_info()
        vmem_cap = int(getattr(info, "vmem_capacity_bytes", 128 << 20))
        if vmem_cap <= (64 << 20):          # v7x-class TensorCore
            return 5 << 20
    except Exception:
        pass
    return 2 << 20


def softmax_t(x, temperature, dim=1, *, target_block_bytes=None,
              donate_input=False):
    """Equivalent of SoftmaxT(temperature, dim).forward(x) for 4-D NCHW input."""
    assert x.ndim == 4 and dim == 1, "kernel specialized for NCHW, softmax over dim=1"
    # TODO(synk): temperature is baked in as a static Python float; pass it as
    # an SMEM scalar if it must vary at runtime without recompiles.
    B, C, H, W = x.shape
    hw = H * W

    # Contiguous NCHW -> [B, C, H*W] is a pure metadata reshape.
    x3 = x.reshape(B, C, hw)

    itemsize = jnp.dtype(x.dtype).itemsize
    sublane = max(8, 32 // itemsize)                 # f32: 8, bf16: 16, int8: 32
    c_pad = ((C + sublane - 1) // sublane) * sublane  # physical sublane-padded C

    if target_block_bytes is None:
        target_block_bytes = _default_target_block_bytes()

    # Lane-dense tile along H*W, sized from the *physical* (sublane-padded)
    # input-block footprint.
    max_tile_hw = max(128, (target_block_bytes // (c_pad * itemsize)) // 128 * 128)
    tile_hw = min(max_tile_hw, pl.cdiv(hw, 128) * 128)

    # Guarantee >= ~4 grid steps when possible: keeps prefetch/compute overlap
    # alive and gives both v7x TensorCores work on the ("parallel","parallel")
    # grid instead of collapsing to a single exposed-DMA step.
    min_steps = 4
    if B * pl.cdiv(hw, tile_hw) < min_steps:
        want_tiles = pl.cdiv(min_steps, B)
        tile_hw = max(128, pl.cdiv(pl.cdiv(hw, want_tiles), 128) * 128)

    n_tiles = pl.cdiv(hw, tile_hw)      # last block may be partial; see kernel note
    grid = (B, n_tiles)

    # Physical VMEM footprint: double-buffered in + out blocks (native dtype,
    # sublane-padded) plus the two f32 intermediates (scaled x, e) in the body,
    # plus headroom for Mosaic internal scratch.
    block_native = c_pad * tile_hw * itemsize
    block_f32 = c_pad * tile_hw * 4
    vmem_limit = int(min(max(4 * block_native + 2 * block_f32 + (4 << 20),
                             16 << 20),
                         48 << 20))

    kernel = functools.partial(
        _softmax_t_kernel,
        inv_temperature=1.0 / float(temperature),
        channels=C,
    )

    out3 = pl.pallas_call(
        kernel,
        out_shape=jax.ShapeDtypeStruct((B, C, hw), x.dtype),
        grid_spec=pl.GridSpec(
            grid=grid,
            in_specs=[pl.BlockSpec((1, C, tile_hw), lambda b, t: (b, 0, t))],
            out_specs=pl.BlockSpec((1, C, tile_hw), lambda b, t: (b, 0, t)),
        ),
        compiler_params=pltpu.CompilerParams(
            dimension_semantics=("parallel", "parallel"),
            vmem_limit_bytes=vmem_limit,
        ),
        cost_estimate=pl.CostEstimate(
            flops=5 * B * C * hw,
            transcendentals=B * C * hw + B * hw,      # exp per element + recip per column
            bytes_accessed=2 * B * C * hw * itemsize,  # one read + one write of x
        ),
        # Opt-in alias: halves peak HBM allocation when the caller knows x is
        # dead (e.g. inference graphs).  Off by default so x stays valid.
        input_output_aliases=({0: 0} if donate_input else {}),
    )(x3)

    return out3.reshape(B, C, H, W)


if __name__ == "__main__":
    key = jax.random.PRNGKey(0)
    k1, k2 = jax.random.split(key)
    temperature = 4.0

    # Case 1: small static C (unrolled sublane-reduce path), hw a multiple of 128.
    x1 = jax.random.normal(k1, (2, 4, 16, 16), dtype=jnp.float32)
    out1 = jax.block_until_ready(softmax_t(x1, temperature, dim=1))
    ref1 = jax.nn.softmax(x1 / temperature, axis=1)
    assert out1.shape == x1.shape
    assert jnp.allclose(out1, ref1, atol=1e-5, rtol=1e-5), "mismatch (case 1)"

    # Case 2: hw not a multiple of 128 (partial last block, masked store) and
    # C > 8 (compiler sublane-reduce path).
    x2 = jax.random.normal(k2, (1, 10, 7, 7), dtype=jnp.float32)
    out2 = jax.block_until_ready(softmax_t(x2, temperature, dim=1))
    ref2 = jax.nn.softmax(x2 / temperature, axis=1)
    assert out2.shape == x2.shape
    assert jnp.allclose(out2, ref2, atol=1e-5, rtol=1e-5), "mismatch (case 2)"

    print("KERNEL_OK")
</pallas_src>

<mosaic_0001>
module attributes {stable_mosaic.version = 11 : i64} {
  func.func @_softmax_t_kernel(%arg0: i32, %arg1: i32, %arg2: memref<1x4x128xf32, #tpu.memory_space<vmem>>, %arg3: memref<1x4x128xf32, #tpu.memory_space<vmem>>) attributes {dimension_semantics = [#tpu.dimension_semantics<parallel>, #tpu.dimension_semantics<parallel>], iteration_bounds = array<i64: 2, 2>, scalar_prefetch = 0 : i64, scratch_operands = 0 : i64, tpu.core_type = #tpu.core_type<tc>, window_params = [{transform_indices = @transform_0, window_bounds = array<i64: 1, 4, 128>}, {transform_indices = @transform_1, window_bounds = array<i64: 1, 4, 128>}]} {
    %c0 = arith.constant 0 : index
    %c0_0 = arith.constant 0 : index
    %c0_1 = arith.constant 0 : index
    %0 = vector.load %arg2[%c0, %c0_0, %c0_1] : memref<1x4x128xf32, #tpu.memory_space<vmem>>, vector<1x4x128xf32>
    %1 = vector.shape_cast %0 : vector<1x4x128xf32> to vector<4x128xf32>
    %cst = arith.constant 2.500000e-01 : f32
    %2 = vector.broadcast %cst : f32 to vector<4x128xf32>
    %3 = arith.mulf %1, %2 : vector<4x128xf32>
    %4 = vector.extract_strided_slice %3 {offsets = [0, 0], sizes = [1, 128], strides = [1, 1]} : vector<4x128xf32> to vector<1x128xf32>
    %5 = vector.extract_strided_slice %3 {offsets = [1, 0], sizes = [1, 128], strides = [1, 1]} : vector<4x128xf32> to vector<1x128xf32>
    %6 = arith.maximumf %4, %5 : vector<1x128xf32>
    %7 = vector.extract_strided_slice %3 {offsets = [2, 0], sizes = [1, 128], strides = [1, 1]} : vector<4x128xf32> to vector<1x128xf32>
    %8 = arith.maximumf %6, %7 : vector<1x128xf32>
    %9 = vector.extract_strided_slice %3 {offsets = [3, 0], sizes = [1, 128], strides = [1, 1]} : vector<4x128xf32> to vector<1x128xf32>
    %10 = arith.maximumf %8, %9 : vector<1x128xf32>
    %11 = vector.broadcast %10 : vector<1x128xf32> to vector<4x128xf32>
    %12 = arith.subf %3, %11 : vector<4x128xf32>
    %13 = math.exp %12 : vector<4x128xf32>
    %14 = vector.extract_strided_slice %13 {offsets = [0, 0], sizes = [1, 128], strides = [1, 1]} : vector<4x128xf32> to vector<1x128xf32>
    %15 = vector.extract_strided_slice %13 {offsets = [1, 0], sizes = [1, 128], strides = [1, 1]} : vector<4x128xf32> to vector<1x128xf32>
    %16 = arith.addf %14, %15 : vector<1x128xf32>
    %17 = vector.extract_strided_slice %13 {offsets = [2, 0], sizes = [1, 128], strides = [1, 1]} : vector<4x128xf32> to vector<1x128xf32>
    %18 = arith.addf %16, %17 : vector<1x128xf32>
    %19 = vector.extract_strided_slice %13 {offsets = [3, 0], sizes = [1, 128], strides = [1, 1]} : vector<4x128xf32> to vector<1x128xf32>
    %20 = arith.addf %18, %19 : vector<1x128xf32>
    %21 = tpu.reciprocal %20 : vector<1x128xf32> -> vector<1x128xf32>
    %22 = vector.broadcast %21 : vector<1x128xf32> to vector<4x128xf32>
    %23 = arith.mulf %13, %22 : vector<4x128xf32>
    %c0_2 = arith.constant 0 : index
    %c0_3 = arith.constant 0 : index
    %c0_4 = arith.constant 0 : index
    %24 = vector.load %arg3[%c0_2, %c0_3, %c0_4] : memref<1x4x128xf32, #tpu.memory_space<vmem>>, vector<1x4x128xf32>
    %25 = vector.shape_cast %24 : vector<1x4x128xf32> to vector<4x128xf32>
    %26 = vector.shape_cast %23 : vector<4x128xf32> to vector<1x4x128xf32>
    tpu.vector_store %arg3[%c0_2, %c0_3, %c0_4], %26 {strides = array<i32>} : memref<1x4x128xf32, #tpu.memory_space<vmem>>, vector<1x4x128xf32>,
    return
  }
  func.func @transform_0(%arg0: i32, %arg1: i32) -> (i32, i32, i32) {
    %c0_i32 = arith.constant 0 : i32
    %c0_i32_0 = arith.constant 0 : i32
    return %arg0, %c0_i32, %arg1 : i32, i32, i32
  }
  func.func @transform_1(%arg0: i32, %arg1: i32) -> (i32, i32, i32) {
    %c0_i32 = arith.constant 0 : i32
    %c0_i32_0 = arith.constant 0 : i32
    return %arg0, %c0_i32, %arg1 : i32, i32, i32
  }
}

</mosaic_0001>

<bundles_post_ra>
// kernel: tpu_custom_call.1
= control target key start
LH: loop header
LB: loop body
LE: loop exit
PB: predicated region body
PF: predicated region fallthrough
CT: control target
= control target key end

     0   :  { %6 = vsyncpa [#allocation3], 0  ;;  %s724_s0 = inlined_call_operand.hbm [shape: f32[2,4,256], index: 0, kind: input, shape index: {}]   ;;  %s725_s1 = inlined_call_operand.hbm [shape: f32[2,4,256], index: 1, kind: output, shape index: {}]  }
   0x1   :  { %8 = vsyncpa [#allocation3 + $0x1], 0 }
   0x2   :  { %9 = vsyncpa [#allocation4], 0 }
   0x3   :  { %11 = vsyncpa [#allocation4 + $0x1], 0  ;;  %s526_s6 = smov 0   ;;  %s528_s7 = smov 0  }
   0x4   :  { %s530_s8 = smov 0   ;;  %s532_s9 = smov 0  }
   0x5   :  { %s534_s10 = smov 0   ;;  %s536_s11 = smov 0  }
   0x6   :  { %s538_s12 = smov 0   ;;  %s540_s13 = smov 0  }
   0x7 LB: > { %s287_s14 = sadd.s32 4294967295, %s512_s13   ;;  %s288_s15 = sadd.s32 4294967294, %s512_s13   ;;  %s512_s13 = sphi %s540_s13, %s17_s13   ;;  %s508_s12 = sphi %s538_s12, %s742_s12   ;;  %s504_s11 = sphi %s536_s11, %s741_s11   ;;  %s500_s10 = sphi %s534_s10, %s740_s10   ;;  %s496_s9 = sphi %s532_s9, %s739_s9   ;;  %s492_s8 = sphi %s530_s8, %s738_s8   ;;  %s488_s7 = sphi %s528_s7, %s737_s7   ;;  %s484_s6 = sphi %s526_s6, %s736_s6  }
   0x8   : > { %s26_s16 = sadd.s32 1, %s504_s11  ;;  %s29_s17 = sadd.s32 1, %s508_s12 }
   0x9   : > { %p27_p0 = scmp.ge.s32.totalorder %s26_s16, 2  ;;  %s38_s18 = sadd.s32 1, %s492_s8 }
   0xa   : > { %p45_p1 = scmp.ne.s32.totalorder %s492_s8, %s488_s7  ;;  %p46_p2 = scmp.eq.s32.totalorder %s512_s13, 0 }
   0xb   : > { %s744_s16 = smov (%p27_p0, %s26_s16), 0  ;;  %s746_s17 = smov (!%p27_p0, %s29_s17), %s508_s12 }
   0xc   : > { %s34_s19 = ssub.s32 %s504_s11, %s744_s16  ;;  %p579_p3 = por %p46_p2, %p45_p1 }
   0xd   : > { %p31_p4 = scmp.ge.s32.totalorder %s746_s17, 2  ;;  %p51_p5 = scmp.ne.s32.totalorder %s488_s7, %s484_s6 }
   0xe   : > { %p52_p6 = scmp.eq.s32.totalorder %s287_s14, 0  ;;  %p77_p7 = scmp.eq.s32.totalorder %s287_s14, 3 }
   0xf   : > { %s748_s17 = smov (%p31_p4, %s746_s17), 0  ;;  %p83_p10 = scmp.eq.s32.totalorder %s288_s15, 3 }
  0x10   : > { %p587_p8 = por %p52_p6, %p51_p5  ;;  %p591_p9 = por %p77_p7, %p45_p1 }
  0x11   : > { %s33_s23 = ssub.s32 %s508_s12, %s748_s17  ;;  %p597_p12 = por %p83_p10, %p51_p5 }
  0x12   : > { %s729_s22 = scalar_select %p591_p9, 1, 0 }
  0x13   : > { %s35_s24 = sor.u32 %s34_s19, %s33_s23  ;;  %p314_p13 = scmp.lt.s32.totalorder %s512_s13, 4 }
  0x14   : > { %p36_p11 = scmp.eq.s32.totalorder %s35_s24, 0  ;;  %s103_s26 = sand.u32 1, %s492_s8  }
  0x15   : > { %s730_s25 = scalar_select %p597_p12, 1, 0 }
  0x16   : > { %s604_s27 = scalar_select %p36_p11, %s492_s8, %s38_s18  }
  0x17   : > { %s291_s28 = sshll.u32 %s103_s26, 2  ;;  %s292_s29 = sshll.u32 %s508_s12, 1 }
  0x18   : > { %s112_s30 = sadd.s32 %s504_s11, %s292_s29  ;;  %s107_s2 = scalar_lea.vmem [#allocation2], %s291_s28 }
  0x19   : > { %s116_s3 = sshll.u32 %s107_s2, 4  ;;  %s293_s4 = sshll.u32 %s112_s30, 6  ;;  %s608_s3 = int_to_ptr.vmem [resolvable:$true] %s116_s3 }
  0x1a   : > { %s613_s15 = scalar_lea.hbm %s724_s0, %s293_s4  ;;  %p617_p0 = pnand %p314_p13, %p579_p3 }
  0x1b   : > { %s104_s19 = scalar_lea.sflag [#allocation3], %s103_s26  ;;  %s384_s23 = scalar_lea.hbm %s613_s15, 64 }
  0x1c   : > { %p385_p4 = scmp.ne.s32.totalorder %s613_s15, %s384_s23  ;;  %p386_p5 = pneg %p617_p0 }
  0x1d   : > { %s389_s28 = scalar_lea.hbm %s724_s0, 256  ;;  %p390_p3 = scmp.lt.u32.totalorder %s613_s15, %s724_s0 }
  0x1e   : > { %p387_p6 = pnand %p386_p5, %p385_p4  ;;  %p391_p10 = scmp.lt.u32.totalorder %s389_s28, %s384_s23 }
  0x1f   : > { %p393_p13 = scmp.lt.u32.totalorder %s384_s23, %s613_s15 }
  0x20   : > { %p388_p7 = pneg %p387_p6  ;;  %p392_p11 = por %p391_p10, %p390_p3 }
  0x22   : > { %p394_p1 = por %p393_p13, %p392_p11 }
  0x24   : > { %p395_p2 = pnand %p394_p1, %p388_p7 }
  0x26   : > { %398 = shalt.err (!%p395_p2)
}
  0x27   : > { %s399_s26 = scalar_lea.vmem %s608_s3, 64  ;;  %s514_s2 = smov [#allocation2]  }
  0x28   : > { %p400_p4 = scmp.ne.s32.totalorder %s608_s3, %s399_s26  ;;  %s404_s4 = sshll.u32 %s514_s2, 4  ;;  %s405_s4 = int_to_ptr.vmem [resolvable:$false] %s404_s4 }
  0x29   : > { %s406_s5 = scalar_lea.vmem %s405_s4, 128  ;;  %p407_p9 = scmp.lt.s32.totalorder %s608_s3, %s405_s4 }
  0x2a   : > { %p402_p6 = pnand %p400_p4, %p386_p5  ;;  %p408_p3 = scmp.lt.s32.totalorder %s406_s5, %s399_s26 }
  0x2c   : > { %p403_p12 = pneg %p402_p6  ;;  %p409_p10 = por %p408_p3, %p407_p9 }
  0x2e   : > { %p410_p11 = pnand %p409_p10, %p403_p12 }
  0x30   : > { %413 = shalt.err (!%p410_p11)
}
  0x31   : > { %309 = dma.hbm_to_vmem [thread:$0]  (!%p617_p0), %s613_s15, 64, %s608_s3, %s104_s19  }
  0x32   : > { %p732_p1 = scmp.lt.s32.totalorder %s512_s13, 5  ;;  %p733_p2 = scmp.ge.s32.totalorder %s512_s13, 1 }
  0x34   : > { %p122_p5 = pnand %p733_p2, %p732_p1 }
  0x35   : > { %s653_s14 = sand.u32 (!%p122_p5), 1, %s488_s7  }
  0x36   : > { %125 = sbr.rel (%p122_p5) target bundleno = 127 (0x7f), region = 24  ;;  %s295_s23 = sshll.u32 (!%p122_p5), %s653_s14, 2 }
  0x37   : > { %s128_s20 = scalar_lea.sflag (!%p122_p5), [#allocation3], %s653_s14  ;;  %s131_s18 = scalar_lea.vmem (!%p122_p5), [#allocation2], %s295_s23 }
  0x3d   : > { %475 = dma.done.wait (%p587_p8), %s128_s20, 64  }
  0x3e   : > { %477 = vsyncadd (%p587_p8), %s128_s20, 4294967232  ;;  %v162_v0 = vlaneseq  ;;  %v150_v1 = vld [vmem:[%s131_s18] sm:$0xf]  ;;  %s298_s21 = sshll.u32 %s500_s10, 1  ;;  %s149_s15 = scalar_lea.vmem [#allocation5], %s295_s23 }
  0x3f   : > { %v151_v2 = vmul.f32 0.25, %v150_v1  ;;  %s198_s3 = sadd.s32 %s496_s9, %s298_s21  ;;  %s202_s19 = sshll.u32 %s149_s15, 4  ;;  %s667_s19 = int_to_ptr.vmem [resolvable:$true] %s202_s19 }
  0x40   : > { %v163_v5 = vshrl.u32 %v162_v0, 7  ;;  %s299_s24 = sshll.u32 %s198_s3, 6  ;;  %s187_s10 = scalar_lea.sflag [#allocation4], %s653_s14 }
  0x41   : > { %v153_v3 = vrot.slane %v151_v2, 1  ;;  %v156_v4 = vrot.slane %v151_v2, 2  ;;  %v159_v7 = vrot.slane %v151_v2, 3  ;;  %s672_s30 = scalar_lea.hbm %s725_s1, %s299_s24  ;;  %s414_s9 = scalar_lea.vmem %s667_s19, 64 }
  0x42   : > { %v164_v9 = vsub.s32 0, %v163_v5  ;;  %p415_p8 = scmp.ne.s32.totalorder %s667_s19, %s414_s9  ;;  %p734_p9 = scmp.ne.s32.totalorder %s729_s22, 0 }
  0x43   : > { %v155_v6 = vmax.f32 %v151_v2, %v153_v3  ;;  %s515_s26 = smov [#allocation5]  }
  0x44   : > { %p416_p12 = pnand %p415_p8, %p734_p9  ;;  %s418_s2 = sshll.u32 %s515_s26, 4  ;;  %s419_s2 = int_to_ptr.vmem [resolvable:$false] %s418_s2 }
  0x45   : > { %v158_v8 = vmax.f32 %v155_v6, %v156_v4  ;;  %s420_s4 = scalar_lea.vmem %s419_s2, 128  ;;  %p421_p7 = scmp.lt.s32.totalorder %s667_s19, %s419_s2 }
  0x46   : > { %p417_p0 = pneg %p416_p12  ;;  %p422_p13 = scmp.lt.s32.totalorder %s420_s4, %s414_s9 }
  0x47   : > { %v161_v10 = vmax.f32 %v158_v8, %v159_v7 }
  0x48   : > { %p423_p4 = por %p422_p13, %p421_p7 }
  0x49   : > { %v165_v11 = vrot.slane %v161_v10, %v164_v9 }
  0x4a   : > { %p424_p6 = pnand %p423_p4, %p417_p0 }
  0x4b   : > { %v166_v12 = vsub.f32 %v151_v2, %v165_v11 }
  0x4d   : > { %v167_v13 = vmul.f32 1.442695, %v166_v12 }
  0x4f   : > { %380 = vpow2.f32 %v167_v13 }
  0x59   : > { %v381_v14 = vpop.eup %380 }
  0x5a   : > { %v170_v15 = vrot.slane %v381_v14, 1  ;;  %v173_v16 = vrot.slane %v381_v14, 2  ;;  %v176_v18 = vrot.slane %v381_v14, 3 }
  0x5c   : > { %v172_v17 = vadd.f32 %v381_v14, %v170_v15 }
  0x5e   : > { %v175_v19 = vadd.f32 %v173_v16, %v172_v17 }
  0x60   : > { %v178_v20 = vadd.f32 %v176_v18, %v175_v19 }
  0x62   : > { %382 = vrcp.f32 %v178_v20 }
  0x6c   : > { %v383_v21 = vpop.eup %382 }
  0x6d   : > { %v183_v22 = vrot.slane %v383_v21, %v164_v9 }
  0x6f   : > { %v184_v23 = vmul.f32 %v381_v14, %v183_v22 }
  0x71   : > { %185 = vst [vmem:[%s149_s15] sm:$0xf] %v184_v23 }
  0x72   : > { %427 = shalt.err (!%p424_p6)
}
  0x73   : > { %s428_s5 = scalar_lea.hbm %s672_s30, 64  ;;  %s432_s20 = scalar_lea.hbm %s725_s1, 256 }
  0x74   : > { %p429_p3 = scmp.ne.s32.totalorder %s672_s30, %s428_s5  ;;  %p433_p1 = scmp.lt.u32.totalorder %s672_s30, %s725_s1 }
  0x75   : > { %p434_p2 = scmp.lt.u32.totalorder %s432_s20, %s428_s5  ;;  %p436_p8 = scmp.lt.u32.totalorder %s428_s5, %s672_s30 }
  0x76   : > { %p430_p10 = pnand %p429_p3, %p734_p9 }
  0x77   : > { %p435_p5 = por %p434_p2, %p433_p1 }
  0x78   : > { %p431_p11 = pneg %p430_p10 }
  0x79   : > { %p437_p12 = por %p436_p8, %p435_p5 }
  0x7b   : > { %p438_p0 = pnand %p437_p12, %p431_p11 }
  0x7d   : > { %441 = shalt.err (!%p438_p0)
}
  0x7e   : > { %304 = dma.vmem_to_hbm [thread:$0]  (%p734_p9), %s667_s19, 64, %s672_s30, %s187_s10  }
  0x7f PF: > { %p315_p7 = scmp.ge.s32.totalorder %s512_s13, 2  ;;  %s214_s3 = sand.u32 1, %s484_s6  }
  0x80   : > { %p735_p13 = scmp.ne.s32.totalorder %s730_s25, 0  ;;  %s215_s15 = scalar_lea.sflag [#allocation4], %s214_s3 }
  0x82   : > { %p311_p4 = pnand %p315_p7, %p735_p13 }
  0x84   : > { %479 = dma.done.wait (!%p311_p4), %s215_s15, 64  }
  0x85   : > { %481 = vsyncadd (!%p311_p4), %s215_s15, 4294967232  ;;  %s17_s13 = sadd.s32 1, %s512_s13   ;;  %s736_s6 = smov %s488_s7 }
  0x86   : > { %p14_p6 = scmp.ge.s32.totalorder %s17_s13, 6   ;;  %s737_s7 = smov %s492_s8 }
  0x87   : > { %s738_s8 = smov %s604_s27  ;;  %s739_s9 = smov %s504_s11 }
  0x88   : > { %s740_s10 = smov %s508_s12  ;;  %s741_s11 = smov %s744_s16 }
  0x89   : > { %s742_s12 = smov %s748_s17  ;;  %16 = sbr.rel (!%p14_p6) target bundleno = 7 (0x7), region = 69 }
  0x90   :  { %220 = vsyncpa [#allocation3], 1 }
  0x91   :  { %222 = vsyncpa [#allocation3 + $0x1], 1 }
  0x92   :  { %223 = vsyncpa [#allocation4], 1 }
  0x93   :  { %225 = vsyncpa [#allocation4 + $0x1], 1 }

</bundles_post_ra>
